<compile_context>
chip_gen: v6e
topology: v6e:2x2x1
jax: 0.10.0
libtpu: 0.0.40
codegen_flags: <defaults>
</compile_context>

<pallas_src>
import functools

import jax
import jax.numpy as jnp
from jax import lax
from jax.experimental import pallas as pl
from jax.experimental.pallas import tpu as pltpu

_EPS = 1e-5
_SUBLANES = 8
_TILE_BYTES_TARGET = 4 * 1024 * 1024  # ~4 MiB of streamed data per grid step


def _round_up(x, m):
    return (x + m - 1) // m * m


def _vmem_limit_bytes():
    """Per-generation VMEM budget (v7x: 64 MiB physical, v5e/v6e: 128 MiB)."""
    cap = 64 * 1024 * 1024
    try:
        cap = int(pltpu.get_tpu_info().vmem_capacity_bytes)
    except Exception:
        pass
    return int(min(cap * 3 // 4, 100 * 1024 * 1024))


def _tile_rows(m, bytes_per_row, vmem_limit, max_tile_rows=None):
    """Byte-targeted row-tile size: ~4 MiB per step, multiple of 8 sublanes."""
    target = min(_TILE_BYTES_TARGET, vmem_limit // 8)
    rows = max(_SUBLANES, target // max(bytes_per_row, 1))
    rows = max(_SUBLANES, (rows // _SUBLANES) * _SUBLANES)
    rows = min(rows, _round_up(m, _SUBLANES))
    if max_tile_rows is not None:
        cap = max(_SUBLANES, (max_tile_rows // _SUBLANES) * _SUBLANES)
        rows = min(rows, cap)
    return rows


# ---------------------------------------------------------------------------
# Fused path: x resident in VMEM, single kernel.
# ---------------------------------------------------------------------------
def _fused_kernel(x_ref, gamma_ref, beta_ref, w_ref, b_ref, o_ref, *, m_total):
    x = x_ref[...]                                           # (M, V) f32
    inv_m = jnp.float32(1.0 / m_total)
    # Exact two-pass mean/var (x is resident, extra VPU work is free).
    mean = jnp.sum(x, axis=0, keepdims=True) * inv_m          # (1, V)
    d = x - mean
    var = jnp.sum(d * d, axis=0, keepdims=True) * inv_m       # (1, V)
    inv_std = lax.rsqrt(var + _EPS)
    scale = gamma_ref[...] * inv_std                          # (1, V)
    shift = beta_ref[...] - mean * scale                      # (1, V)
    wf = w_ref[...] * scale                                   # (L, V)
    bf = lax.dot_general(shift, w_ref[...], (((1,), (1,)), ((), ())),
                         preferred_element_type=jnp.float32,
                         precision=lax.Precision.HIGHEST) + b_ref[...]   # (1, L)
    o_ref[...] = lax.dot_general(x, wf, (((1,), (1,)), ((), ())),
                                 preferred_element_type=jnp.float32,
                                 precision=lax.Precision.HIGHEST) + bf


# ---------------------------------------------------------------------------
# Streaming path: stats pass -> tiny fold kernel -> folded-linear pass.
# ---------------------------------------------------------------------------
def _stats_kernel(x_ref, sum_ref, sq_ref, *, m_total):
    i = pl.program_id(0)

    @pl.when(i == 0)
    def _():
        sum_ref[...] = jnp.zeros_like(sum_ref)
        sq_ref[...] = jnp.zeros_like(sq_ref)

    tm = x_ref.shape[0]
    rows = i * tm + lax.broadcasted_iota(jnp.int32, (tm, 1), 0)
    x = jnp.where(rows < m_total, x_ref[...], 0.0)            # ragged tile mask
    # f32 VPU/XLU column sums (exact; no MXU bf16 truncation).
    sum_ref[...] += jnp.sum(x, axis=0, keepdims=True)
    sq_ref[...] += jnp.sum(x * x, axis=0, keepdims=True)


def _fold_kernel(sum_ref, sq_ref, gamma_ref, beta_ref, w_ref, b_ref,
                 wf_ref, bf_ref, *, m_total):
    inv_m = jnp.float32(1.0 / m_total)
    mean = sum_ref[...] * inv_m
    var = jnp.maximum(sq_ref[...] * inv_m - mean * mean, 0.0)  # one-pass, clamped
    inv_std = lax.rsqrt(var + _EPS)
    scale = gamma_ref[...] * inv_std
    shift = beta_ref[...] - mean * scale
    wf_ref[...] = w_ref[...] * scale
    bf_ref[...] = lax.dot_general(shift, w_ref[...], (((1,), (1,)), ((), ())),
                                  preferred_element_type=jnp.float32,
                                  precision=lax.Precision.HIGHEST) + b_ref[...]


def _linear_kernel(x_ref, wf_ref, bf_ref, o_ref):
    # o = x @ Wf^T + bf ; each output row depends only on its own input row, so
    # garbage rows of a ragged last tile only land in discarded OOB stores.
    o_ref[...] = lax.dot_general(x_ref[...], wf_ref[...],
                                 (((1,), (1,)), ((), ())),
                                 preferred_element_type=jnp.float32,
                                 precision=lax.Precision.HIGHEST) + bf_ref[...]


# ---------------------------------------------------------------------------
# Wrapper
# ---------------------------------------------------------------------------
def val_embed_forward(code, bn_gamma, bn_beta, fc_weight, fc_bias,
                      *, force_streaming=False, max_tile_rows=None):
    """ValEmbed forward: training-mode BatchNorm1d(V) + Linear(V -> L).

    code: (B, T, V); returns (B, T, L) float32.
    """
    B, T, V = code.shape
    L = fc_weight.shape[0]
    M = B * T

    x = code.reshape(M, V).astype(jnp.float32)
    gamma = bn_gamma.reshape(1, V).astype(jnp.float32)
    beta = bn_beta.reshape(1, V).astype(jnp.float32)
    w = fc_weight.astype(jnp.float32)                 # (L, V): no host transpose
    b = fc_bias.reshape(1, L).astype(jnp.float32)

    vmem_limit = _vmem_limit_bytes()
    cost = pl.CostEstimate(flops=2 * M * V * L, transcendentals=0,
                           bytes_accessed=4 * (M * V + M * L + L * V + 2 * V + L))

    x_bytes = 4 * M * V
    o_bytes = 4 * M * L
    w_bytes = 4 * (L * V + 2 * V + L)
    fused_fits = 2 * (x_bytes + o_bytes + w_bytes) + (1 << 20) <= vmem_limit // 2

    if fused_fits and not force_streaming:
        out = pl.pallas_call(
            functools.partial(_fused_kernel, m_total=M),
            out_shape=jax.ShapeDtypeStruct((M, L), jnp.float32),
            grid=(1,),
            in_specs=[
                pl.BlockSpec((M, V), lambda i: (0, 0)),
                pl.BlockSpec((1, V), lambda i: (0, 0)),
                pl.BlockSpec((1, V), lambda i: (0, 0)),
                pl.BlockSpec((L, V), lambda i: (0, 0)),
                pl.BlockSpec((1, L), lambda i: (0, 0)),
            ],
            out_specs=pl.BlockSpec((M, L), lambda i: (0, 0)),
            compiler_params=pltpu.CompilerParams(
                dimension_semantics=("arbitrary",),
                vmem_limit_bytes=vmem_limit),
            cost_estimate=cost,
        )(x, gamma, beta, w, b)
        return out.reshape(B, T, L)

    # ---- Streaming path ----------------------------------------------------
    # Phase 1: per-column sum / sum-of-squares over byte-targeted row tiles.
    tm1 = _tile_rows(M, 4 * V, vmem_limit, max_tile_rows)
    n1 = pl.cdiv(M, tm1)
    col_sum, col_sq = pl.pallas_call(
        functools.partial(_stats_kernel, m_total=M),
        out_shape=(jax.ShapeDtypeStruct((1, V), jnp.float32),
                   jax.ShapeDtypeStruct((1, V), jnp.float32)),
        grid=(n1,),
        in_specs=[pl.BlockSpec((tm1, V), lambda i: (i, 0))],
        out_specs=(pl.BlockSpec((1, V), lambda i: (0, 0)),
                   pl.BlockSpec((1, V), lambda i: (0, 0))),
        compiler_params=pltpu.CompilerParams(
            dimension_semantics=("arbitrary",),
            vmem_limit_bytes=vmem_limit),
        cost_estimate=pl.CostEstimate(flops=3 * M * V, transcendentals=0,
                                      bytes_accessed=4 * (M * V + 2 * V)),
    )(x)

    # Tiny fold kernel: W/gamma/beta/b touched exactly once, off the stats pass.
    wf, bf = pl.pallas_call(
        functools.partial(_fold_kernel, m_total=M),
        out_shape=(jax.ShapeDtypeStruct((L, V), jnp.float32),
                   jax.ShapeDtypeStruct((1, L), jnp.float32)),
        grid=(1,),
        in_specs=[
            pl.BlockSpec((1, V), lambda i: (0, 0)),
            pl.BlockSpec((1, V), lambda i: (0, 0)),
            pl.BlockSpec((1, V), lambda i: (0, 0)),
            pl.BlockSpec((1, V), lambda i: (0, 0)),
            pl.BlockSpec((L, V), lambda i: (0, 0)),
            pl.BlockSpec((1, L), lambda i: (0, 0)),
        ],
        out_specs=(pl.BlockSpec((L, V), lambda i: (0, 0)),
                   pl.BlockSpec((1, L), lambda i: (0, 0))),
        compiler_params=pltpu.CompilerParams(
            dimension_semantics=("arbitrary",),
            vmem_limit_bytes=vmem_limit),
    )(col_sum, col_sq, gamma, beta, w, b)

    # Phase 2: o = x @ Wf^T + bf, independent row tiles ("parallel" shards
    # across the 2 TensorCores on v7x). Output written as (tile_m, L) blocks of
    # the exact (M, L) array -- no 128-column pad, no wrapper slices.
    tm2 = _tile_rows(M, 4 * (V + L), vmem_limit, max_tile_rows)
    n2 = pl.cdiv(M, tm2)
    out = pl.pallas_call(
        _linear_kernel,
        out_shape=jax.ShapeDtypeStruct((M, L), jnp.float32),
        grid=(n2,),
        in_specs=[
            pl.BlockSpec((tm2, V), lambda i: (i, 0)),
            pl.BlockSpec((L, V), lambda i: (0, 0)),
            pl.BlockSpec((1, L), lambda i: (0, 0)),
        ],
        out_specs=pl.BlockSpec((tm2, L), lambda i: (i, 0)),
        compiler_params=pltpu.CompilerParams(
            dimension_semantics=("parallel",),
            vmem_limit_bytes=vmem_limit),
        cost_estimate=cost,
    )(x, wf, bf)

    return out.reshape(B, T, L)


if __name__ == "__main__":
    # Small shapes consistent with the module: batch=2, seq=8, code_vocab=16,
    # latent=32.
    B, T, V, LATENT = 2, 8, 16, 32

    key = jax.random.PRNGKey(0)
    k_code, k_w, k_b, k_g, k_beta, k_code2 = jax.random.split(key, 6)

    code = jax.random.normal(k_code, (B, T, V), dtype=jnp.float32)

    # BN params randomized to exercise the fold (PyTorch default would be 1/0).
    bn_gamma = jax.random.uniform(k_g, (V,), minval=0.5, maxval=1.5,
                                  dtype=jnp.float32)
    bn_beta = 0.1 * jax.random.normal(k_beta, (V,), dtype=jnp.float32)
    bound = 1.0 / (V ** 0.5)
    fc_weight = jax.random.uniform(k_w, (LATENT, V), minval=-bound, maxval=bound,
                                   dtype=jnp.float32)
    fc_bias = jax.random.uniform(k_b, (LATENT,), minval=-bound, maxval=bound,
                                 dtype=jnp.float32)

    def reference(c):
        bb, tt, _ = c.shape
        x2 = c.reshape(bb * tt, V)
        mean = x2.mean(axis=0, keepdims=True)
        var = ((x2 - mean) ** 2).mean(axis=0, keepdims=True)
        y = (x2 - mean) / jnp.sqrt(var + _EPS) * bn_gamma + bn_beta
        return (y @ fc_weight.T + fc_bias).reshape(bb, tt, LATENT)

    # 1) Fused resident-x path (the one realistic LSTMBaseH sizes take).
    out = jax.block_until_ready(
        val_embed_forward(code, bn_gamma, bn_beta, fc_weight, fc_bias))
    ref = reference(code)
    assert out.shape == (B, T, LATENT)
    assert jnp.allclose(out, ref, atol=2e-4, rtol=2e-4), \
        float(jnp.max(jnp.abs(out - ref)))

    # 2) Streaming path with a ragged last row tile (exercises in-kernel
    #    masking and the byte-targeted tiling) -- forced small tiles.
    B2, T2 = 3, 67                       # M = 201 rows, tiles of 64 -> ragged
    code2 = jax.random.normal(k_code2, (B2, T2, V), dtype=jnp.float32)
    out2 = jax.block_until_ready(
        val_embed_forward(code2, bn_gamma, bn_beta, fc_weight, fc_bias,
                          force_streaming=True, max_tile_rows=64))
    ref2 = reference(code2)
    assert out2.shape == (B2, T2, LATENT)
    assert jnp.allclose(out2, ref2, atol=1e-3, rtol=1e-3), \
        float(jnp.max(jnp.abs(out2 - ref2)))

    print("KERNEL_OK")
</pallas_src>

<mosaic_0001>
module attributes {stable_mosaic.version = 11 : i64} {
  func.func @_fused_kernel(%arg0: i32, %arg1: memref<16x16xf32, #tpu.memory_space<vmem>>, %arg2: memref<1x16xf32, #tpu.memory_space<vmem>>, %arg3: memref<1x16xf32, #tpu.memory_space<vmem>>, %arg4: memref<32x16xf32, #tpu.memory_space<vmem>>, %arg5: memref<1x32xf32, #tpu.memory_space<vmem>>, %arg6: memref<16x32xf32, #tpu.memory_space<vmem>>) attributes {dimension_semantics = [#tpu.dimension_semantics<arbitrary>], iteration_bounds = array<i64: 1>, scalar_prefetch = 0 : i64, scratch_operands = 0 : i64, tpu.core_type = #tpu.core_type<tc>, window_params = [{pipeline_mode = #tpu.pipeline_mode<synchronous>, transform_indices = @transform_0, window_bounds = array<i64: 16, 16>}, {pipeline_mode = #tpu.pipeline_mode<synchronous>, transform_indices = @transform_1, window_bounds = array<i64: 1, 16>}, {pipeline_mode = #tpu.pipeline_mode<synchronous>, transform_indices = @transform_2, window_bounds = array<i64: 1, 16>}, {pipeline_mode = #tpu.pipeline_mode<synchronous>, transform_indices = @transform_3, window_bounds = array<i64: 32, 16>}, {pipeline_mode = #tpu.pipeline_mode<synchronous>, transform_indices = @transform_4, window_bounds = array<i64: 1, 32>}, {pipeline_mode = #tpu.pipeline_mode<synchronous>, transform_indices = @transform_5, window_bounds = array<i64: 16, 32>}]} {
    %c0 = arith.constant 0 : index
    %c0_0 = arith.constant 0 : index
    %0 = vector.load %arg1[%c0, %c0_0] : memref<16x16xf32, #tpu.memory_space<vmem>>, vector<16x16xf32>
    %cst = arith.constant dense<0.000000e+00> : vector<16xf32>
    %1 = vector.multi_reduction <add>, %0, %cst [0] : vector<16x16xf32> to vector<16xf32>
    %2 = vector.shape_cast %1 : vector<16xf32> to vector<1x16xf32>
    %cst_1 = arith.constant 6.250000e-02 : f32
    %3 = vector.broadcast %cst_1 : f32 to vector<1x16xf32>
    %4 = arith.mulf %2, %3 : vector<1x16xf32>
    %5 = vector.broadcast %4 : vector<1x16xf32> to vector<16x16xf32>
    %6 = arith.subf %0, %5 : vector<16x16xf32>
    %7 = arith.mulf %6, %6 : vector<16x16xf32>
    %cst_2 = arith.constant dense<0.000000e+00> : vector<16xf32>
    %8 = vector.multi_reduction <add>, %7, %cst_2 [0] : vector<16x16xf32> to vector<16xf32>
    %9 = vector.shape_cast %8 : vector<16xf32> to vector<1x16xf32>
    %cst_3 = arith.constant 6.250000e-02 : f32
    %10 = vector.broadcast %cst_3 : f32 to vector<1x16xf32>
    %11 = arith.mulf %9, %10 : vector<1x16xf32>
    %cst_4 = arith.constant 9.99999974E-6 : f32
    %12 = vector.broadcast %cst_4 : f32 to vector<1x16xf32>
    %13 = arith.addf %11, %12 : vector<1x16xf32>
    %14 = math.rsqrt %13 : vector<1x16xf32>
    %c0_5 = arith.constant 0 : index
    %c0_6 = arith.constant 0 : index
    %15 = vector.load %arg2[%c0_5, %c0_6] : memref<1x16xf32, #tpu.memory_space<vmem>>, vector<1x16xf32>
    %16 = arith.mulf %15, %14 : vector<1x16xf32>
    %c0_7 = arith.constant 0 : index
    %c0_8 = arith.constant 0 : index
    %17 = vector.load %arg3[%c0_7, %c0_8] : memref<1x16xf32, #tpu.memory_space<vmem>>, vector<1x16xf32>
    %18 = arith.mulf %4, %16 : vector<1x16xf32>
    %19 = arith.subf %17, %18 : vector<1x16xf32>
    %c0_9 = arith.constant 0 : index
    %c0_10 = arith.constant 0 : index
    %20 = vector.load %arg4[%c0_9, %c0_10] : memref<32x16xf32, #tpu.memory_space<vmem>>, vector<32x16xf32>
    %21 = vector.broadcast %16 : vector<1x16xf32> to vector<32x16xf32>
    %22 = arith.mulf %20, %21 : vector<32x16xf32>
    %c0_11 = arith.constant 0 : index
    %c0_12 = arith.constant 0 : index
    %23 = vector.load %arg4[%c0_11, %c0_12] : memref<32x16xf32, #tpu.memory_space<vmem>>, vector<32x16xf32>
    %cst_13 = arith.constant dense<0.000000e+00> : vector<1x32xf32>
    %24 = tpu.matmul %19, %23, %cst_13 {dimension_numbers = #tpu.dot_dimension_numbers<[1], [1], [0], [0], [0, 0, 1, 0], [], []>, precision = #tpu.contract_precision<fp32>} : vector<1x16xf32>, vector<32x16xf32>, vector<1x32xf32> -> vector<1x32xf32>
    %c0_14 = arith.constant 0 : index
    %c0_15 = arith.constant 0 : index
    %25 = vector.load %arg5[%c0_14, %c0_15] : memref<1x32xf32, #tpu.memory_space<vmem>>, vector<1x32xf32>
    %26 = arith.addf %24, %25 : vector<1x32xf32>
    %cst_16 = arith.constant dense<0.000000e+00> : vector<16x32xf32>
    %27 = tpu.matmul %0, %22, %cst_16 {dimension_numbers = #tpu.dot_dimension_numbers<[1], [1], [0], [0], [0, 0, 1, 0], [], []>, precision = #tpu.contract_precision<fp32>} : vector<16x16xf32>, vector<32x16xf32>, vector<16x32xf32> -> vector<16x32xf32>
    %28 = vector.broadcast %26 : vector<1x32xf32> to vector<16x32xf32>
    %29 = arith.addf %27, %28 : vector<16x32xf32>
    %c0_17 = arith.constant 0 : index
    %c0_18 = arith.constant 0 : index
    %30 = vector.load %arg6[%c0_17, %c0_18] : memref<16x32xf32, #tpu.memory_space<vmem>>, vector<16x32xf32>
    tpu.vector_store %arg6[%c0_17, %c0_18], %29 {strides = array<i32>} : memref<16x32xf32, #tpu.memory_space<vmem>>, vector<16x32xf32>,
    return
  }
  func.func @transform_0(%arg0: i32) -> (i32, i32) {
    %c0_i32 = arith.constant 0 : i32
    %c0_i32_0 = arith.constant 0 : i32
    %c0_i32_1 = arith.constant 0 : i32
    return %c0_i32, %c0_i32_0 : i32, i32
  }
  func.func @transform_1(%arg0: i32) -> (i32, i32) {
    %c0_i32 = arith.constant 0 : i32
    %c0_i32_0 = arith.constant 0 : i32
    %c0_i32_1 = arith.constant 0 : i32
    return %c0_i32, %c0_i32_0 : i32, i32
  }
  func.func @transform_2(%arg0: i32) -> (i32, i32) {
    %c0_i32 = arith.constant 0 : i32
    %c0_i32_0 = arith.constant 0 : i32
    %c0_i32_1 = arith.constant 0 : i32
    return %c0_i32, %c0_i32_0 : i32, i32
  }
  func.func @transform_3(%arg0: i32) -> (i32, i32) {
    %c0_i32 = arith.constant 0 : i32
    %c0_i32_0 = arith.constant 0 : i32
    %c0_i32_1 = arith.constant 0 : i32
    return %c0_i32, %c0_i32_0 : i32, i32
  }
  func.func @transform_4(%arg0: i32) -> (i32, i32) {
    %c0_i32 = arith.constant 0 : i32
    %c0_i32_0 = arith.constant 0 : i32
    %c0_i32_1 = arith.constant 0 : i32
    return %c0_i32, %c0_i32_0 : i32, i32
  }
  func.func @transform_5(%arg0: i32) -> (i32, i32) {
    %c0_i32 = arith.constant 0 : i32
    %c0_i32_0 = arith.constant 0 : i32
    %c0_i32_1 = arith.constant 0 : i32
    return %c0_i32, %c0_i32_0 : i32, i32
  }
}

</mosaic_0001>

<bundles_post_ra>
// kernel: tpu_custom_call.1
= control target key start
LH: loop header
LB: loop body
LE: loop exit
PB: predicated region body
PF: predicated region fallthrough
CT: control target
= control target key end

     0   :  { %vm23_vm0 = vcmask 130048   ;;  %v1366_v2 = vmov 0.0   ;;  %vm1367_vm1 = vmmov 0   ;;  %s1671_s0 = inlined_call_operand.vmem [shape: f32[16,16], index: 0, kind: input, shape index: {}]   ;;  %s1672_s1 = inlined_call_operand.vmem [shape: f32[1,16], index: 1, kind: input, shape index: {}]   ;;  %s1673_s2 = inlined_call_operand.vmem [shape: f32[1,16], index: 2, kind: input, shape index: {}]   ;;  %s1674_s3 = inlined_call_operand.vmem [shape: f32[32,16], index: 3, kind: input, shape index: {}]   ;;  %s1675_s4 = inlined_call_operand.vmem [shape: f32[1,32], index: 4, kind: input, shape index: {}]   ;;  %s1676_s5 = inlined_call_operand.hbm [shape: f32[16,32], index: 5, kind: output, shape index: {}]  }
   0x1   :  { %v21_v0 = vld [vmem:[%s1671_s0] sm:$0xff]  ;;  %v22_v1 = vld [vmem:[%s1671_s0 + $0x8] sm:$0xff]  ;;  %1205 = vmatprep.subr.mxu0 %v1366_v2  ;;  %1216 = vmatprep.subr.mxu1 %v1366_v2  ;;  %v1414_v5 = vld [vmem:[%s1674_s3 + $0x18] sm:$0xff] }
   0x2   :  { %v24_v3 = vsel %vm23_vm0, %v21_v0, 0.0  ;;  %v25_v4 = vsel %vm23_vm0, %v22_v1, 0.0  ;;  %v1419_v6 = vld [vmem:[%s1674_s3 + $0x10] sm:$0xff]  ;;  %v1424_v7 = vld [vmem:[%s1674_s3 + $0x8] sm:$0xff]  ;;  %v83_v9 = vsel %vm23_vm0, %v1414_v5, 0  ;;  %v1433_v11 = vld [vmem:[%s1674_s3] sm:$0xff]  ;;  %1213 = vmatprep.mubr.msk.f32.mxu0 %vm1367_vm1, %v1366_v2  ;;  %1224 = vmatprep.mubr.msk.f32.mxu1 %vm1367_vm1, %v1366_v2 }
   0x3   :  { %v26_v8 = vadd.f32 %v25_v4, %v24_v3  ;;  %v80_v10 = vsel %vm23_vm0, %v1419_v6, 0  ;;  %v1439_v12 = vand.u32 4294901760, %v83_v9  ;;  %v77_v14 = vsel %vm23_vm0, %v1424_v7, 0 }
   0x4   :  { %v1441_v13 = vand.u32 4294901760, %v80_v10  ;;  %v74_v15 = vsel %vm23_vm0, %v1433_v11, 0 }
   0x5   :  { %10 = vsyncpa [#allocation3], 0  ;;  %v27_v16 = vrot.slane %v26_v8, 4  ;;  %v1447_v17 = vand.u32 4294901760, %v77_v14  ;;  %v1449_v18 = vand.u32 4294901760, %v74_v15  ;;  %1206 = vmatpush3.xpose.msra.mxu0 %v1439_v12  ;;  %v1453_v19 = vsub.f32 %v83_v9, %v1439_v12 }
   0x6   :  { %v1456_v20 = vsub.f32 %v80_v10, %v1441_v13  ;;  %v1459_v21 = vsel %vm23_vm0, %v21_v0, 0  ;;  %v1462_v22 = vsel %vm23_vm0, %v22_v1, 0  ;;  %1207 = vmatprep.subr.mxu0 %v1366_v2  ;;  %v60_v58 = vlaneseq  ;;  %v50_v60 = vld [vmem:[%s1672_s1] sm:$0x1] }
   0x7   :  { %v28_v23 = vadd.f32 %v27_v16, %v26_v8  ;;  %v1466_v24 = vsub.f32 %v77_v14, %v1447_v17  ;;  %v191_v25 = vand.u32 4294901760, %v1453_v19  ;;  %v1479_v31 = vsub.f32 %v74_v15, %v1449_v18 }
   0x8   :  { %v198_v26 = vand.u32 4294901760, %v1456_v20  ;;  %v1499_v59 = vshrl.u32 %v60_v58, 7  ;;  %vm1120_vm2 = vcmask 261120  }
   0x9   :  { %v29_v27 = vrot.slane %v28_v23, 2  ;;  %v192_v28 = vsub.f32 %v1453_v19, %v191_v25  ;;  %1208 = vmatpush3.xpose.msra.mxu0 %v1441_v13  ;;  %v205_v30 = vand.u32 4294901760, %v1466_v24  ;;  %v212_v37 = vand.u32 4294901760, %v1479_v31 }
   0xa   :  { %v199_v29 = vsub.f32 %v1456_v20, %v198_v26  ;;  %1209 = vmatprep.subr.mxu0 %v1366_v2  ;;  %v62_v61 = vsub.s32 0, %v1499_v59 }
   0xb   :  { %v30_v32 = vadd.f32 %v29_v27, %v28_v23  ;;  %v193_v33 = vand.u32 4294901760, %v192_v28  ;;  %v206_v36 = vsub.f32 %v1466_v24, %v205_v30  ;;  %v213_v41 = vsub.f32 %v1479_v31, %v212_v37 }
   0xc   :  { %v200_v35 = vand.u32 4294901760, %v199_v29 }
   0xd   :  { %v31_v34 = vrot.slane %v30_v32, 1  ;;  %1217 = vmatpush3.xpose.msra.mxu1 %v193_v33  ;;  %1210 = vmatpush3.xpose.msra.mxu0 %v1447_v17  ;;  %v207_v40 = vand.u32 4294901760, %v206_v36  ;;  %v214_v46 = vand.u32 4294901760, %v213_v41 }
   0xe   :  { %1218 = vmatprep.subr.mxu1 %v1366_v2  ;;  %1211 = vmatprep.subr.mxu0 %v1366_v2 }
   0xf   :  { %v32_v38 = vadd.f32 %v31_v34, %v30_v32 }
  0x11   :  { %v33_v39 = vmul.f32 0.0625, %v32_v38  ;;  %1219 = vmatpush3.xpose.msra.mxu1 %v200_v35  ;;  %1212 = vmatpush3.xpose.msra.mxu0 %v1449_v18 }
  0x12   :  { %1220 = vmatprep.subr.mxu1 %v1366_v2  ;;  %1227 = vmatprep.subr.mxu0 %v1366_v2 }
  0x13   :  { %v34_v42 = vsub.f32 %v21_v0, %v33_v39  ;;  %v35_v43 = vsub.f32 %v22_v1, %v33_v39  ;;  %v52_v1 = vld [vmem:[%s1673_s2] sm:$0x1] }
  0x15   :  { %v36_v44 = vmul.f32 %v34_v42, %v34_v42  ;;  %v37_v45 = vmul.f32 %v35_v43, %v35_v43  ;;  %1221 = vmatpush3.xpose.msra.mxu1 %v207_v40  ;;  %v1575_v42 = vand.u32 4294901760, %v1459_v21 }
  0x16   :  { %1222 = vmatprep.subr.mxu1 %v1366_v2 }
  0x17   :  { %v38_v47 = vsel %vm23_vm0, %v36_v44, 0.0  ;;  %v39_v48 = vsel %vm23_vm0, %v37_v45, 0.0 }
  0x18   :  { %v40_v49 = vadd.f32 %v39_v48, %v38_v47 }
  0x19   :  { %1223 = vmatpush3.xpose.msra.mxu1 %v214_v46 }
  0x1a   :  { %v41_v50 = vrot.slane %v40_v49, 4  ;;  %1238 = vmatprep.subr.mxu1 %v1366_v2 }
  0x1c   :  { %v42_v51 = vadd.f32 %v41_v50, %v40_v49 }
  0x1e   :  { %v43_v52 = vrot.slane %v42_v51, 2 }
  0x20   :  { %v44_v53 = vadd.f32 %v43_v52, %v42_v51 }
  0x22   :  { %v45_v54 = vrot.slane %v44_v53, 1 }
  0x24   :  { %v46_v55 = vadd.f32 %v45_v54, %v44_v53 }
  0x26   :  { %v47_v56 = vmul.f32 0.0625, %v46_v55 }
  0x28   :  { %v48_v57 = vadd.f32 1e-05, %v47_v56 }
  0x2a   :  { %1342 = vrsqrt.f32 %v48_v57 }
  0x37   :  { %v1343_v62 = vpop.eup %1342 }
  0x38   :  { %v51_v63 = vmul.f32 %v1343_v62, %v50_v60  ;;  %v69_v62 = vld [vmem:[%s1675_s4] sm:$0x1]  ;;  %s1368_s4 = smov [#allocation2]  }
  0x39   :  { %s1128_s7 = sshll.u32 %s1368_s4, 4  ;;  %s1129_s7 = int_to_ptr.vmem [resolvable:$true] %s1128_s7 }
  0x3a   :  { %v63_v0 = vrot.slane %v51_v63, %v62_v61  ;;  %v53_v3 = vmul.f32 %v51_v63, %v33_v39  ;;  %s1344_s8 = scalar_lea.vmem %s1129_s7, 256  ;;  %p1349_p1 = scmp.lt.s32.totalorder %s1129_s7, %s1129_s7 }
  0x3b   :  { %p1345_p0 = scmp.ne.s32.totalorder %s1129_s7, %s1344_s8  ;;  %p1350_p2 = scmp.lt.s32.totalorder %s1344_s8, %s1344_s8 }
  0x3c   :  { %v68_v4 = vmul.f32 %v63_v0, %v1414_v5  ;;  %v67_v8 = vmul.f32 %v63_v0, %v1419_v6  ;;  %v66_v9 = vmul.f32 %v63_v0, %v1424_v7  ;;  %v65_v10 = vmul.f32 %v63_v0, %v1433_v11 }
  0x3d   :  { %v54_v14 = vsub.f32 %v52_v1, %v53_v3  ;;  %p1351_p3 = por %p1350_p2, %p1349_p1 }
  0x3e   :  { %v590_v15 = vsel %vm23_vm0, %v68_v4, 0  ;;  %v587_v16 = vsel %vm23_vm0, %v67_v8, 0  ;;  %v584_v23 = vsel %vm23_vm0, %v66_v9, 0  ;;  %v581_v27 = vsel %vm23_vm0, %v65_v10, 0 }
  0x3f   :  { %v71_v28 = vsel %vm23_vm0, %v54_v14, 0  ;;  %v1531_v32 = vand.u32 4294901760, %v590_v15  ;;  %v1539_v33 = vand.u32 4294901760, %v587_v16  ;;  %v1548_v35 = vand.u32 4294901760, %v584_v23  ;;  %p1352_p4 = pnand %p1351_p3, %p1345_p0 }
  0x40   :  { %v1519_v29 = vand.u32 4294901760, %v71_v28 }
  0x41   :  { %v1544_v34 = vsub.f32 %v590_v15, %v1531_v32  ;;  %v1556_v38 = vsub.f32 %v587_v16, %v1539_v33  ;;  %v1572_v41 = vsub.f32 %v584_v23, %v1548_v35 }
  0x42   :  { %v155_v5 = vsub.f32 %v71_v28, %v1519_v29  ;;  %1225 = vmatmul.mubr.f32.vlgmr.msra.gmra.mxu1 %v1519_v29 }
  0x43   :  { %1239 = vmatpush3.xpose.msra.mxu1 %v1439_v12  ;;  %1246 = vmatprep.mubr.msk.f32.mxu1 %vm1367_vm1, %v1366_v2  ;;  %v1553_v36 = vand.u32 4294901760, %v1544_v34  ;;  %v1569_v40 = vand.u32 4294901760, %v1556_v38  ;;  %v1585_v44 = vand.u32 4294901760, %v1572_v41 }
  0x44   :  { %v156_v6 = vand.u32 4294901760, %v155_v5  ;;  %1240 = vmatprep.subr.mxu1 %v1366_v2 }
  0x45   :  { %v709_v39 = vsub.f32 %v1544_v34, %v1553_v36  ;;  %v716_v43 = vsub.f32 %v1556_v38, %v1569_v40 }
  0x46   :  { %v157_v7 = vsub.f32 %v155_v5, %v156_v6 }
  0x47   :  { %1241 = vmatpush3.xpose.msra.mxu1 %v1441_v13 }
  0x48   :  { %v158_v11 = vand.u32 4294901760, %v157_v7  ;;  %1242 = vmatprep.subr.mxu1 %v1366_v2 }
  0x4a   :  { %1214 = vmatmul.mubr.f32.vlgmr.msra.gmra.mxu0 %v158_v11 }
  0x4b   :  { %1228 = vmatpush3.xpose.msra.mxu0 %v1453_v19  ;;  %1243 = vmatpush3.xpose.msra.mxu1 %v1447_v17  ;;  %v717_v19 = vand.u32 4294901760, %v716_v43 }
  0x4c   :  { %1229 = vmatprep.subr.mxu0 %v1366_v2  ;;  %1244 = vmatprep.subr.mxu1 %v1366_v2 }
  0x4d   :  { %1235 = vmatprep.mubr.msk.f32.mxu0 %vm1367_vm1, %v1366_v2 }
  0x4f   :  { %1230 = vmatpush3.xpose.msra.mxu0 %v1456_v20  ;;  %1245 = vmatpush3.xpose.msra.mxu1 %v1449_v18 }
  0x50   :  { %1231 = vmatprep.subr.mxu0 %v1366_v2  ;;  %1260 = vmatprep.subr.mxu1 %v1366_v2 }
  0x52   :  { %1247 = vmatmul.mubr.f32.vlgmr.msra.gmra.mxu1 %v156_v6 }
  0x53   :  { %1232 = vmatpush3.xpose.msra.mxu0 %v1466_v24  ;;  %1261 = vmatpush3.xpose.msra.mxu1 %v1439_v12  ;;  %v1562_v12 = vand.u32 4294901760, %v581_v27 }
  0x54   :  { %1233 = vmatprep.subr.mxu0 %v1366_v2  ;;  %1262 = vmatprep.subr.mxu1 %v1366_v2 }
  0x55   :  { %1268 = vmatprep.mubr.msk.f32.mxu1 %vm1367_vm1, %v1366_v2  ;;  %v1588_v45 = vsub.f32 %v581_v27, %v1562_v12 }
  0x57   :  { %1234 = vmatpush3.xpose.msra.mxu0 %v1479_v31  ;;  %1263 = vmatpush3.xpose.msra.mxu1 %v1441_v13  ;;  %v710_v13 = vand.u32 4294901760, %v709_v39  ;;  %v1601_v46 = vand.u32 4294901760, %v1588_v45 }
  0x58   :  { %1249 = vmatprep.subr.mxu0 %v1366_v2  ;;  %1264 = vmatprep.subr.mxu1 %v1366_v2 }
  0x59   :  { %v730_v20 = vsub.f32 %v1588_v45, %v1601_v46 }
  0x5a   :  { %1236 = vmatmul.mubr.f32.vlgmr.msra.gmra.mxu0 %v155_v5 }
  0x5b   :  { %1250 = vmatpush3.xpose.msra.mxu0 %v191_v25  ;;  %1265 = vmatpush3.xpose.msra.mxu1 %v1447_v17  ;;  %v662_v17 = vsub.f32 %v1459_v21, %v1575_v42  ;;  %v723_v25 = vsub.f32 %v1572_v41, %v1585_v44  ;;  %v731_v24 = vand.u32 4294901760, %v730_v20 }
  0x5c   :  { %1251 = vmatprep.subr.mxu0 %v1366_v2  ;;  %1266 = vmatprep.subr.mxu1 %v1366_v2 }
  0x5d   :  { %1257 = vmatprep.mubr.msk.f32.mxu0 %vm1367_vm1, %v1366_v2  ;;  %v663_v47 = vand.u32 4294901760, %v662_v17 }
  0x5f   :  { %1252 = vmatpush3.xpose.msra.mxu0 %v198_v26  ;;  %1267 = vmatpush3.xpose.msra.mxu1 %v1449_v18  ;;  %v724_v18 = vand.u32 4294901760, %v723_v25  ;;  %v664_v21 = vsub.f32 %v662_v17, %v663_v47  ;;  %v1611_v26 = vand.u32 4294901760, %v1462_v22 }
  0x60   :  { %1253 = vmatprep.subr.mxu0 %v1366_v2  ;;  %1282 = vmatprep.subr.mxu1 %v710_v13 }
  0x62   :  { %1269 = vmatmul.mubr.f32.vlgmr.msra.gmra.mxu1 %v1519_v29 }
  0x63   :  { %1254 = vmatpush3.xpose.msra.mxu0 %v205_v30  ;;  %1283 = vmatpush3.xpose.msra.mxu1 %v710_v13  ;;  %v672_v30 = vsub.f32 %v1462_v22, %v1611_v26 }
  0x64   :  { %1255 = vmatprep.subr.mxu0 %v1366_v2  ;;  %1284 = vmatprep.subr.mxu1 %v717_v19  ;;  %v665_v2 = vand.u32 4294901760, %v664_v21 }
  0x65   :  { %1290 = vmatprep.mubr.f32.mxu1 %v1575_v42  ;;  %v673_v31 = vand.u32 4294901760, %v672_v30 }
  0x67   :  { %1256 = vmatpush3.xpose.msra.mxu0 %v212_v37  ;;  %1285 = vmatpush3.xpose.msra.mxu1 %v717_v19  ;;  %v674_v37 = vsub.f32 %v672_v30, %v673_v31 }
  0x68   :  { %1271 = vmatprep.subr.mxu0 %v1531_v32  ;;  %1286 = vmatprep.subr.mxu1 %v724_v18 }
  0x69   :  { %v675_v22 = vand.u32 4294901760, %v674_v37 }
  0x6a   :  { %1258 = vmatmul.mubr.f32.vlgmr.msra.gmra.mxu0 %v1519_v29 }
  0x6b   :  { %1272 = vmatpush3.xpose.msra.mxu0 %v1531_v32  ;;  %1287 = vmatpush3.xpose.msra.mxu1 %v724_v18 }
  0x6c   :  { %1273 = vmatprep.subr.mxu0 %v1539_v33  ;;  %1288 = vmatprep.subr.mxu1 %v731_v24 }
  0x6d   :  { %1279 = vmatprep.mubr.f32.mxu0 %v665_v2 }
  0x6f   :  { %1274 = vmatpush3.xpose.msra.mxu0 %v1539_v33  ;;  %1289 = vmatpush3.xpose.msra.mxu1 %v731_v24 }
  0x70   :  { %1275 = vmatprep.subr.mxu0 %v1548_v35  ;;  %1304 = vmatprep.subr.mxu1 %v1531_v32 }
  0x72   :  { %1291 = vmatmul.mubr.f32.vlgmr.msra.gmra.mxu1 %v1611_v26 }
  0x73   :  { %1276 = vmatpush3.xpose.msra.mxu0 %v1548_v35  ;;  %1305 = vmatpush3.xpose.msra.mxu1 %v1531_v32 }
  0x74   :  { %1277 = vmatprep.subr.mxu0 %v1562_v12  ;;  %1306 = vmatprep.subr.mxu1 %v1539_v33 }
  0x75   :  { %1312 = vmatprep.mubr.f32.mxu1 %v663_v47 }
  0x77   :  { %1278 = vmatpush3.xpose.msra.mxu0 %v1562_v12  ;;  %1307 = vmatpush3.xpose.msra.mxu1 %v1539_v33 }
  0x78   :  { %1293 = vmatprep.subr.mxu0 %v1544_v34  ;;  %1308 = vmatprep.subr.mxu1 %v1548_v35 }
  0x7a   :  { %1280 = vmatmul.mubr.f32.vlgmr.msra.gmra.mxu0 %v675_v22 }
  0x7b   :  { %1294 = vmatpush3.xpose.msra.mxu0 %v1544_v34  ;;  %1309 = vmatpush3.xpose.msra.mxu1 %v1548_v35 }
  0x7c   :  { %1295 = vmatprep.subr.mxu0 %v1556_v38  ;;  %1310 = vmatprep.subr.mxu1 %v1562_v12 }
  0x7d   :  { %1301 = vmatprep.mubr.f32.mxu0 %v662_v17 }
  0x7f   :  { %1296 = vmatpush3.xpose.msra.mxu0 %v1556_v38  ;;  %1311 = vmatpush3.xpose.msra.mxu1 %v1562_v12 }
  0x80   :  { %1297 = vmatprep.subr.mxu0 %v1572_v41  ;;  %1326 = vmatprep.subr.mxu1 %v1531_v32 }
  0x82   :  { %1313 = vmatmul.mubr.f32.vlgmr.msra.gmra.mxu1 %v673_v31 }
  0x83   :  { %1298 = vmatpush3.xpose.msra.mxu0 %v1572_v41  ;;  %1327 = vmatpush3.xpose.msra.mxu1 %v1531_v32 }
  0x84   :  { %1299 = vmatprep.subr.mxu0 %v1588_v45  ;;  %1328 = vmatprep.subr.mxu1 %v1539_v33 }
  0x85   :  { %1334 = vmatprep.mubr.f32.mxu1 %v1575_v42 }
  0x87   :  { %1300 = vmatpush3.xpose.msra.mxu0 %v1588_v45  ;;  %1329 = vmatpush3.xpose.msra.mxu1 %v1539_v33 }
  0x88   :  { %1315 = vmatprep.subr.mxu0 %v1553_v36  ;;  %1330 = vmatprep.subr.mxu1 %v1548_v35 }
  0x8a   :  { %1302 = vmatmul.mubr.f32.vlgmr.msra.gmra.mxu0 %v672_v30 }
  0x8b   :  { %1316 = vmatpush3.xpose.msra.mxu0 %v1553_v36  ;;  %1331 = vmatpush3.xpose.msra.mxu1 %v1548_v35 }
  0x8c   :  { %1317 = vmatprep.subr.mxu0 %v1569_v40  ;;  %1332 = vmatprep.subr.mxu1 %v1562_v12 }
  0x8d   :  { %1323 = vmatprep.mubr.f32.mxu0 %v1575_v42 }
  0x8f   :  { %1318 = vmatpush3.xpose.msra.mxu0 %v1569_v40  ;;  %1333 = vmatpush3.xpose.msra.mxu1 %v1562_v12 }
  0x90   :  { %1319 = vmatprep.subr.mxu0 %v1585_v44 }
  0x92   :  { %1335 = vmatmul.mubr.f32.vlgmr.msra.gmra.mxu1 %v1611_v26 }
  0x93   :  { %1320 = vmatpush3.xpose.msra.mxu0 %v1585_v44 }
  0x94   :  { %1321 = vmatprep.subr.mxu0 %v1601_v46 }
  0x97   :  { %1322 = vmatpush3.xpose.msra.mxu0 %v1601_v46 }
  0x9a   :  { %1324 = vmatmul.mubr.f32.vlgmr.msra.gmra.mxu0 %v1611_v26 }
 0x102   :  { %v251_v48 = vpop.f32.mrf.mxu1 }
 0x104   :  { %v1226_v49 = vpop.f32.mrf.mxu1 }
 0x10a   :  { %v160_v50 = vpop.f32.mrf.mxu0 }
 0x10b   :  { %v161_v63 = vadd.f32 %v160_v50, %v69_v62 }
 0x10c   :  { %v1215_v51 = vpop.f32.mrf.mxu0 }
 0x10d   :  { %v252_v0 = vadd.f32 %v251_v48, %v161_v63 }
 0x112   :  { %v408_v52 = vpop.f32.mrf.mxu1 }
 0x114   :  { %v1248_v53 = vpop.f32.mrf.mxu1 }
 0x11a   :  { %v331_v54 = vpop.f32.mrf.mxu0 }
 0x11b   :  { %v332_v1 = vadd.f32 %v331_v54, %v252_v0 }
 0x11c   :  { %v1237_v55 = vpop.f32.mrf.mxu0 }
 0x11d   :  { %v409_v3 = vadd.f32 %v408_v52, %v332_v1 }
 0x122   :  { %v566_v56 = vpop.f32.mrf.mxu1 }
 0x124   :  { %v1270_v57 = vpop.f32.mrf.mxu1 }
 0x12a   :  { %v491_v58 = vpop.f32.mrf.mxu0 }
 0x12b   :  { %v492_v4 = vadd.f32 %v491_v58, %v409_v3 }
 0x12c   :  { %v1259_v60 = vpop.f32.mrf.mxu0 }
 0x12d   :  { %v567_v8 = vadd.f32 %v566_v56, %v492_v4 }
 0x12f   :  { %v573_v10 = vrot.slane %v567_v8, %v62_v61 }
 0x132   :  { %v1292_v14 = vpop.f32.mrf.mxu1 }
 0x134   :  { %v768_v28 = vpop.f32.mrf.mxu1 }
 0x13a   :  { %v1281_v9 = vpop.f32.mrf.mxu0 }
 0x13b   :  { %v678_v16 = vadd.f32 %v1281_v9, %v573_v10 }
 0x13c   :  { %v667_v15 = vpop.f32.mrf.mxu0 }
 0x13d   :  { %v668_v27 = vadd.f32 %v667_v15, %v573_v10  ;;  %v775_v29 = vadd.f32 %v1292_v14, %v678_v16 }
 0x13f   :  { %v769_v7 = vadd.f32 %v768_v28, %v668_v27 }
 0x142   :  { %v1314_v5 = vpop.f32.mrf.mxu1 }
 0x144   :  { %v938_v33 = vpop.f32.mrf.mxu1 }
 0x14a   :  { %v1303_v23 = vpop.f32.mrf.mxu0 }
 0x14b   :  { %v862_v11 = vadd.f32 %v1303_v23, %v775_v29 }
 0x14c   :  { %v854_v6 = vpop.f32.mrf.mxu0 }
 0x14d   :  { %v855_v32 = vadd.f32 %v854_v6, %v769_v7  ;;  %v947_v34 = vadd.f32 %v1314_v5, %v862_v11 }
 0x14f   :  { %v939_v38 = vadd.f32 %v938_v33, %v855_v32 }
 0x152   :  { %v1336_v36 = vpop.f32.mrf.mxu1 }
 0x154   :  { %v1110_v40 = vpop.f32.mrf.mxu1 }
 0x15a   :  { %v1325_v35 = vpop.f32.mrf.mxu0 }
 0x15b   :  { %v1036_v12 = vadd.f32 %v1325_v35, %v947_v34 }
 0x15c   :  { %v1029_v59 = vpop.f32.mrf.mxu0 }
 0x15d   :  { %v1117_v61 = vadd.f32 %v1336_v36, %v1036_v12  ;;  %v1030_v39 = vadd.f32 %v1029_v59, %v939_v38 }
 0x15f   :  { %1122 = vst.msk [vmem:[#allocation2 + $0x8] sm:$0xff] %vm1120_vm2, %v1117_v61  ;;  %v1111_v41 = vadd.f32 %v1110_v40, %v1030_v39 }
 0x161   :  { %1121 = vst.msk [vmem:[#allocation2] sm:$0xff] %vm1120_vm2, %v1111_v41 }
 0x162   :  { %1355 = shalt.err (!%p1352_p4)
}
 0x163   :  { %s1369_s9 = smov 128   ;;  %s1370_s10 = smov 8  }
 0x164   :  { %1134 = dma.vmem_to_hbm [thread:$0]  %s1129_s7, 256, %s1676_s5, [#allocation3], %s1369_s9, %s1369_s9, %s1370_s10  }
 0x165   :  { %1364 = dma.done.wait [#allocation3], 256  }
 0x166   :  { %1365 = vsyncadd [#allocation3], 4294967040 }
 0x167   :  { %1138 = vsyncpa [#allocation3], 1 }

</bundles_post_ra>
